<compile_context>
chip_gen: v7x
topology: tpu7x:2x2x1
jax: 0.10.0
libtpu: 0.0.40
codegen_flags: <defaults>
</compile_context>

<pallas_src>
import math

import numpy as np
import jax
import jax.numpy as jnp
from jax.experimental import pallas as pl
from jax.experimental.pallas import tpu as pltpu


def _round_up(x, m):
    return ((x + m - 1) // m) * m


def _time_encode_kernel(t_ref, w_ref, b_ref, o_ref):
    # t_ref: (tile_m, P)    packed time values (P original rows per output row)
    # w_ref: (P, P*D)       block-diagonal weight (resident)
    # b_ref: (1, P*D)       bias tiled P times along lanes (resident)
    # o_ref: (tile_m, P*D)  lane-dense output block
    t = t_ref[...]
    w = w_ref[...]
    if t.shape[1] == 1:
        # P == 1: plain broadcast multiply; no need for the MXU.
        z = t * w
    else:
        # Block-diagonal matmul on the MXU: z[m, p*D+d] = t[m, p] * weight[d].
        z = jnp.dot(t, w, preferred_element_type=jnp.float32)
    o_ref[...] = jnp.cos(z + b_ref[...]).astype(o_ref.dtype)


def time_encode(t, weight, bias=None, *, tile_m=4096, out_dtype=jnp.float32):
    """cos(t[..., None] * weight + bias): [B, S] float -> [B, S, D]."""
    B, S = t.shape
    D = int(weight.shape[0])
    N = B * S
    if bias is None:
        bias = jnp.zeros((D,), jnp.float32)

    # Lane-packing factor: pack P original rows per output row so the output's
    # last dim is 128 lanes (when possible).  P must also divide N so the packed
    # buffer is a pure reshape of the logical output (no post-kernel slice).
    p_full = (128 // D) if (D <= 128 and 128 % D == 0) else 1
    P = math.gcd(N, p_full)
    W = P * D
    M = N // P

    itemsize = jnp.dtype(out_dtype).itemsize
    sub = {4: 8, 2: 16, 1: 32}.get(itemsize, 8)   # sublane tile for out_dtype
    if M <= 8 * sub:
        tm = M                                     # single full-extent block (always legal)
    else:
        # Aim for >= 8 grid steps (pipelining + v7x megacore), capped at tile_m.
        tm = min(int(tile_m), _round_up(pl.cdiv(M, 8), sub))
        tm = max(sub, _round_up(tm, sub))
    grid = pl.cdiv(M, tm)

    # NOTE: if profiles ever show waits on the (tm, P) t-block DMA, feed t
    # transposed as (P, M) with a (P, tm) lane-dense block and contract on
    # axis 0 of the matmul instead.
    t_packed = t.reshape(M, P).astype(jnp.float32)
    w_row = weight.astype(jnp.float32).reshape(1, D)
    wblk = jnp.kron(jnp.eye(P, dtype=jnp.float32), w_row)                 # (P, P*D)
    b_full = jnp.tile(bias.astype(jnp.float32).reshape(1, D), (1, P))     # (1, P*D)

    out_packed = pl.pallas_call(
        _time_encode_kernel,
        out_shape=jax.ShapeDtypeStruct((M, W), out_dtype),
        grid_spec=pltpu.PrefetchScalarGridSpec(
            num_scalar_prefetch=0,
            grid=(grid,),
            in_specs=[
                pl.BlockSpec((tm, P), lambda i: (i, 0)),   # packed t rows
                pl.BlockSpec((P, W), lambda i: (0, 0)),    # block-diag weight (resident)
                pl.BlockSpec((1, W), lambda i: (0, 0)),    # bias (resident)
            ],
            out_specs=pl.BlockSpec((tm, W), lambda i: (i, 0)),
        ),
        compiler_params=pltpu.CompilerParams(
            dimension_semantics=("parallel",),             # megacore split on v7x
        ),
        cost_estimate=pl.CostEstimate(
            flops=2 * N * D,
            transcendentals=N * D,
            bytes_accessed=4 * N + 4 * (P + 1) * W + itemsize * N * D,
        ),
    )(t_packed, wblk, b_full)

    # (M, P*D) is a row-major view of (N, D): this reshape is a free bitcast.
    return out_packed.reshape(B, S, D)


if __name__ == "__main__":
    # Deterministic parameter init exactly as in the module's __init__.
    dimension = 32
    weight = jnp.asarray(1.0 / 10 ** np.linspace(0, 9, dimension), dtype=jnp.float32)
    bias = jnp.zeros((dimension,), dtype=jnp.float32)   # zero at init, kept as an input

    # Small example inputs consistent with the forward: batch=2, seq=8.
    key = jax.random.PRNGKey(0)
    t = jax.random.uniform(key, (2, 8), dtype=jnp.float32) * 100.0

    out = time_encode(t, weight, bias)
    out = jax.block_until_ready(out)

    # Reference: torch.cos(self.w(t.unsqueeze(2))) with the same weight/bias.
    ref = jnp.cos(t[:, :, None] * weight[None, None, :] + bias[None, None, :])
    assert out.shape == (2, 8, dimension)
    np.testing.assert_allclose(np.asarray(out), np.asarray(ref), rtol=1e-4, atol=1e-4)

    print("KERNEL_OK")
</pallas_src>

<mosaic_0001>
module attributes {stable_mosaic.version = 11 : i64} {
  func.func @_time_encode_kernel(%arg0: i32, %arg1: memref<4x4xf32, #tpu.memory_space<vmem>>, %arg2: memref<4x128xf32, #tpu.memory_space<vmem>>, %arg3: memref<1x128xf32, #tpu.memory_space<vmem>>, %arg4: memref<4x128xf32, #tpu.memory_space<vmem>>) attributes {dimension_semantics = [#tpu.dimension_semantics<parallel>], iteration_bounds = array<i64: 1>, scalar_prefetch = 0 : i64, scratch_operands = 0 : i64, tpu.core_type = #tpu.core_type<tc>, window_params = [{transform_indices = @transform_0, window_bounds = array<i64: 4, 4>}, {pipeline_mode = #tpu.pipeline_mode<synchronous>, transform_indices = @transform_1, window_bounds = array<i64: 4, 128>}, {pipeline_mode = #tpu.pipeline_mode<synchronous>, transform_indices = @transform_2, window_bounds = array<i64: 1, 128>}, {transform_indices = @transform_3, window_bounds = array<i64: 4, 128>}]} {
    %c0 = arith.constant 0 : index
    %c0_0 = arith.constant 0 : index
    %0 = vector.load %arg1[%c0, %c0_0] : memref<4x4xf32, #tpu.memory_space<vmem>>, vector<4x4xf32>
    %c0_1 = arith.constant 0 : index
    %c0_2 = arith.constant 0 : index
    %1 = vector.load %arg2[%c0_1, %c0_2] : memref<4x128xf32, #tpu.memory_space<vmem>>, vector<4x128xf32>
    %cst = arith.constant dense<0.000000e+00> : vector<4x128xf32>
    %2 = tpu.matmul %0, %1, %cst {dimension_numbers = #tpu.dot_dimension_numbers<[1], [0], [0], [1], [0, 0, 1, 1], [], []>} : vector<4x4xf32>, vector<4x128xf32>, vector<4x128xf32> -> vector<4x128xf32>
    %c0_3 = arith.constant 0 : index
    %c0_4 = arith.constant 0 : index
    %3 = vector.load %arg3[%c0_3, %c0_4] : memref<1x128xf32, #tpu.memory_space<vmem>>, vector<1x128xf32>
    %4 = vector.broadcast %3 : vector<1x128xf32> to vector<4x128xf32>
    %5 = arith.addf %2, %4 : vector<4x128xf32>
    %6 = math.cos %5 : vector<4x128xf32>
    %c0_5 = arith.constant 0 : index
    %c0_6 = arith.constant 0 : index
    %7 = vector.load %arg4[%c0_5, %c0_6] : memref<4x128xf32, #tpu.memory_space<vmem>>, vector<4x128xf32>
    tpu.vector_store %arg4[%c0_5, %c0_6], %6 {strides = array<i32>} : memref<4x128xf32, #tpu.memory_space<vmem>>, vector<4x128xf32>,
    return
  }
  func.func @transform_0(%arg0: i32) -> (i32, i32) {
    %c0_i32 = arith.constant 0 : i32
    %c0_i32_0 = arith.constant 0 : i32
    return %arg0, %c0_i32 : i32, i32
  }
  func.func @transform_1(%arg0: i32) -> (i32, i32) {
    %c0_i32 = arith.constant 0 : i32
    %c0_i32_0 = arith.constant 0 : i32
    %c0_i32_1 = arith.constant 0 : i32
    return %c0_i32, %c0_i32_0 : i32, i32
  }
  func.func @transform_2(%arg0: i32) -> (i32, i32) {
    %c0_i32 = arith.constant 0 : i32
    %c0_i32_0 = arith.constant 0 : i32
    %c0_i32_1 = arith.constant 0 : i32
    return %c0_i32, %c0_i32_0 : i32, i32
  }
  func.func @transform_3(%arg0: i32) -> (i32, i32) {
    %c0_i32 = arith.constant 0 : i32
    %c0_i32_0 = arith.constant 0 : i32
    return %arg0, %c0_i32 : i32, i32
  }
}

</mosaic_0001>

<bundles_post_ra>
// kernel: tpu_custom_call.1
= control target key start
LH: loop header
LB: loop body
LE: loop exit
PB: predicated region body
PF: predicated region fallthrough
CT: control target
= control target key end

     0   :  { %8 = vsyncpa [#allocation3], 0  ;;  %s442_s0 = inlined_call_operand.hbm [shape: f32[4,4], index: 0, kind: input, shape index: {}]   ;;  %s443_s1 = inlined_call_operand.hbm [shape: f32[4,128], index: 1, kind: input, shape index: {}]   ;;  %s444_s2 = inlined_call_operand.vmem [shape: f32[1,128], index: 2, kind: input, shape index: {}]   ;;  %s445_s3 = inlined_call_operand.hbm [shape: f32[4,128], index: 3, kind: output, shape index: {}]  }
   0x1   :  { %9 = vsyncpa [#allocation6], 0 }
   0x2   :  { %10 = vsyncpa [#allocation4], 0  ;;  %s351_s12 = smov [#allocation2]   ;;  %s352_s14 = smov [#allocation5]  }
   0x3   :  { %s17_s13 = sshll.u32 %s351_s12, 4  ;;  %s27_s15 = sshll.u32 %s352_s14, 4  ;;  %s18_s13 = int_to_ptr.vmem [resolvable:$true] %s17_s13  ;;  %s28_s15 = int_to_ptr.vmem [resolvable:$true] %s27_s15 }
   0x4   :  { %s279_s18 = scalar_lea.hbm %s442_s0, 64 }
   0x5   :  { %p280_p0 = scmp.ne.s32.totalorder %s442_s0, %s279_s18  ;;  %p283_p1 = scmp.lt.u32.totalorder %s279_s18, %s442_s0 }
   0x7   :  { %p285_p2 = pnand %p283_p1, %p280_p0 }
   0x9   :  { %288 = shalt.err (!%p285_p2)
}
   0xa   :  { %s289_s23 = scalar_lea.vmem %s18_s13, 64  ;;  %p294_p4 = scmp.lt.s32.totalorder %s18_s13, %s18_s13 }
   0xb   :  { %p290_p3 = scmp.ne.s32.totalorder %s18_s13, %s289_s23  ;;  %p295_p5 = scmp.lt.s32.totalorder %s289_s23, %s289_s23 }
   0xd   :  { %p296_p6 = por %p295_p5, %p294_p4 }
   0xf   :  { %p297_p7 = pnand %p296_p6, %p290_p3 }
  0x11   :  { %300 = shalt.err (!%p297_p7)
}
  0x12   :  { %20 = dma.hbm_to_vmem [thread:$0]  %s442_s0, 64, %s18_s13, [#allocation3]  }
  0x13   :  { %s301_s28 = scalar_lea.hbm %s443_s1, 64 }
  0x14   :  { %p302_p8 = scmp.ne.s32.totalorder %s443_s1, %s301_s28  ;;  %p305_p9 = scmp.lt.u32.totalorder %s301_s28, %s443_s1 }
  0x16   :  { %p307_p10 = pnand %p305_p9, %p302_p8 }
  0x18   :  { %310 = shalt.err (!%p307_p10)
}
  0x19   :  { %s311_s6 = scalar_lea.vmem %s28_s15, 64  ;;  %p316_p12 = scmp.lt.s32.totalorder %s28_s15, %s28_s15 }
  0x1a   :  { %p312_p11 = scmp.ne.s32.totalorder %s28_s15, %s311_s6  ;;  %p317_p13 = scmp.lt.s32.totalorder %s311_s6, %s311_s6 }
  0x1c   :  { %p318_p0 = por %p317_p13, %p316_p12 }
  0x1e   :  { %p319_p1 = pnand %p318_p0, %p312_p11 }
  0x20   :  { %322 = shalt.err (!%p319_p1)
}
  0x21   :  { %30 = dma.hbm_to_vmem [thread:$0]  %s443_s1, 64, %s28_s15, [#allocation6]  }
  0x22   :  { %345 = dma.done.wait [#allocation3], 64  }
  0x23   :  { %346 = vsyncadd [#allocation3], 4294967232 }
  0x24   :  { %347 = dma.done.wait [#allocation6], 64  }
  0x25   :  { %348 = vsyncadd [#allocation6], 4294967232  ;;  %v353_v0 = vmov 0.0   ;;  %vm354_vm0 = vmmov 0   ;;  %vm52_vm1 = vcmask 1043456   ;;  %vm48_vm2 = vcmask 31744  }
  0x26   :  { %255 = vmatprep.subr.mxu0 %v353_v0  ;;  %257 = vmatprep.mubr.msk.f32.mxu0 %vm354_vm0, %v353_v0  ;;  %v40_v1 = vld [vmem:[#allocation5] sm:$0xf]  ;;  %v39_v2 = vld [vmem:[#allocation2] sm:$0xf]  ;;  %v355_v17 = vmov 683565275  }
  0x27   :  { %256 = vmatpush3.msk.msra.mxu0 %vm52_vm1, %v40_v1  ;;  %v246_v3 = vld [vmem:[%s444_s2] ss:$0 sm:$0xff]  ;;  %v356_v19 = vmov 2475754826   ;;  %v357_v22 = vmov 2131351028  }
  0x28   :  { %258 = vmatmul.mubr.msk.f32.vlgmr.msra.gmra.mrb[0].mxu0 %vm48_vm2, %v39_v2  ;;  %v358_v25 = vmov 2102212464   ;;  %v359_v28 = vmov 920167782   ;;  %v360_v31 = vmov 1326507024  }
  0x29   :  { %s361_s1 = smov [#allocation7]  }
  0x2a   :  { %s236_s2 = sshll.u32 %s361_s1, 4  ;;  %s237_s2 = int_to_ptr.vmem [resolvable:$true] %s236_s2 }
  0x2b   :  { %s323_s10 = scalar_lea.vmem %s237_s2, 64  ;;  %p328_p3 = scmp.lt.s32.totalorder %s237_s2, %s237_s2 }
  0x2c   :  { %p324_p2 = scmp.ne.s32.totalorder %s237_s2, %s323_s10  ;;  %p329_p4 = scmp.lt.s32.totalorder %s323_s10, %s323_s10 }
  0x2e   :  { %p330_p5 = por %p329_p4, %p328_p3 }
  0x30   :  { %p331_p6 = pnand %p330_p5, %p324_p2 }
  0xfb   :  { %v122_v4 = vpop.f32.mrb[0].mxu0 }
  0xfc   :  { %v409_v5 = vadd.f32 %v246_v3, %v122_v4  ;;  %v259_v6 = vpop.f32.mrb[1].mxu0 }
  0xfe   :  { %v129_v7 = vand.u32 2139095040, %v409_v5  ;;  %v126_v11 = vand.u32 2147483647, %v409_v5  ;;  %vm128_vm10 = vcmp.lt.s32.totalorder %v409_v5, 0  ;;  %vm218_vm15 = vweird.f32 %v409_v5 }
 0x100   :  { %v130_v8 = vshrl.u32 %v129_v7, 23  ;;  %v133_v14 = vand.u32 8388607, %v126_v11  ;;  %vm127_vm11 = vcmp.le.f32.partialorder %v126_v11, 0.7853982 }
 0x102   :  { %v249_v9 = vadd.s32 4294967169, %v130_v8  ;;  %v134_v33 = vor.u32 8388608, %v133_v14 }
 0x104   :  { %v136_v10 = vadd.s32 1, %v249_v9  ;;  %v174_v47 = vshll.u32 %v134_v33, 8 }
 0x106   :  { %vm137_vm3 = vcmp.gt.s32.totalorder %v136_v10, 0 }
 0x107   :  { %v138_v12 = vsel %vm137_vm3, %v136_v10, 0 }
 0x108   :  { %v140_v13 = vand.u32 31, %v138_v12  ;;  %v139_v16 = vshrl.u32 %v138_v12, 5 }
 0x10a   :  { %v141_v15 = vsub.s32 32, %v140_v13  ;;  %v143_v18 = vshll.u32 %v355_v17, %v140_v13  ;;  %v146_v20 = vshll.u32 %v356_v19, %v140_v13  ;;  %v149_v24 = vshll.u32 %v357_v22, %v140_v13 }
 0x10b   :  { %v152_v27 = vshll.u32 %v358_v25, %v140_v13  ;;  %v155_v30 = vshll.u32 %v359_v28, %v140_v13  ;;  %vm158_vm4 = vcmp.lt.s32.totalorder %v139_v16, 1  ;;  %vm161_vm5 = vcmp.lt.s32.totalorder %v139_v16, 4 }
 0x10c   :  { %v144_v21 = vshrl.u32 %v356_v19, %v141_v15  ;;  %v147_v23 = vshrl.u32 %v357_v22, %v141_v15  ;;  %v150_v26 = vshrl.u32 %v358_v25, %v141_v15  ;;  %v153_v29 = vshrl.u32 %v359_v28, %v141_v15 }
 0x10d   :  { %v156_v32 = vshrl.u32 %v360_v31, %v141_v15  ;;  %v142_v42 = vshrl.u32 %v355_v17, %v141_v15  ;;  %vm160_vm6 = vcmp.lt.s32.totalorder %v139_v16, 3  ;;  %vm159_vm7 = vcmp.lt.s32.totalorder %v139_v16, 2 }
 0x10e   :  { %v145_v34 = vor.u32 %v144_v21, %v143_v18  ;;  %v148_v35 = vor.u32 %v147_v23, %v146_v20  ;;  %v151_v36 = vor.u32 %v150_v26, %v149_v24  ;;  %v154_v37 = vor.u32 %v153_v29, %v152_v27 }
 0x10f   :  { %v157_v38 = vor.u32 %v156_v32, %v155_v30 }
 0x110   :  { %v163_v39 = vsel %vm161_vm5, %v151_v36, 2102212464  ;;  %v166_v40 = vsel %vm158_vm4, %v145_v34, %v148_v35  ;;  %v170_v41 = vsel %vm158_vm4, %v148_v35, %v151_v36  ;;  %v167_v43 = vsel %vm161_vm5, %v154_v37, 920167782 }
 0x111   :  { %v171_v44 = vsel %vm161_vm5, %v157_v38, 1326507024  ;;  %v168_v45 = vsel %vm160_vm6, %v151_v36, %v167_v43  ;;  %v162_v48 = vsel %vm158_vm4, %v142_v42, %v145_v34  ;;  %v164_v49 = vsel %vm160_vm6, %v148_v35, %v163_v39 }
 0x112   :  { %v172_v46 = vsel %vm160_vm6, %v154_v37, %v171_v44  ;;  %v169_v50 = vsel %vm159_vm7, %v166_v40, %v168_v45  ;;  %v165_v56 = vsel %vm159_vm7, %v162_v48, %v164_v49 }
 0x113   :  { %v173_v51 = vsel %vm159_vm7, %v170_v41, %v172_v46  ;;  %v418_v54 = vmul.u32.u64.low %v174_v47, %v169_v50  ;;  %v419_v55 = vmul.u32.u64.high %v174_v47, %v169_v50, %v418_v54  ;;  %v181_v58 = vmul.u32 %v174_v47, %v165_v56 }
 0x114   :  { %v415_v52 = vmul.u32.u64.low %v174_v47, %v173_v51  ;;  %v416_v53 = vmul.u32.u64.high %v174_v47, %v173_v51, %v415_v52 }
 0x115   :  { %v184_v57 = vadd.s32 1, %v419_v55 }
 0x116   :  { %vm183_vm8 = vc.u32 %v416_v53, %v418_v54  ;;  %v182_v7 = vadd.s32 %v418_v54, %v416_v53 }
 0x117   :  { %v185_v59 = vsel %vm183_vm8, %v184_v57, %v419_v55 }
 0x118   :  { %v186_v60 = vadd.s32 %v185_v59, %v181_v58 }
 0x11a   :  { %v187_v61 = vadd.s32 536870912, %v186_v60 }
 0x11c   :  { %v188_v62 = vshrl.u32 %v187_v61, 30 }
 0x11e   :  { %v189_v63 = vshll.u32 %v188_v62, 30  ;;  %v212_v22 = vsub.s32 4, %v188_v62 }
 0x120   :  { %v190_v0 = vsub.s32 %v186_v60, %v189_v63  ;;  %v213_v24 = vsel %vm128_vm10, %v212_v22, %v188_v62 }
 0x121   :  { %v215_v25 = vsel %vm127_vm11, 0, %v213_v24 }
 0x122   :  { %v192_v1 = vsub.s32 0, %v190_v0  ;;  %v219_v26 = vand.u32 3, %v215_v25 }
 0x124   :  { %v250_v2 = vmin.u32 %v192_v1, %v190_v0  ;;  %vm224_vm12 = vcmp.eq.s32.totalorder %v219_v26, 2  ;;  %vm221_vm13 = vcmp.eq.s32.totalorder %v219_v26, 0  ;;  %vm220_vm14 = vcmp.lt.s32.totalorder %v219_v26, 2 }
 0x126   :  { %v194_v3 = vclz %v250_v2 }
 0x128   :  { %v251_v4 = vadd.s32 4294967294, %v194_v3 }
 0x12a   :  { %vm252_vm9 = vcmp.lt.s32.totalorder %v251_v4, 0 }
 0x12b   :  { %v197_v6 = vsel %vm252_vm9, 0, %v251_v4 }
 0x12c   :  { %v198_v8 = vsub.s32 32, %v197_v6  ;;  %v202_v9 = vsub.s32 4294967266, %v197_v6  ;;  %v199_v10 = vshll.u32 %v190_v0, %v197_v6 }
 0x12e   :  { %v200_v12 = vshrl.u32 %v182_v7, %v198_v8  ;;  %v203_v13 = vadd.s32 127, %v202_v9 }
 0x130   :  { %v201_v14 = vor.u32 %v200_v12, %v199_v10  ;;  %v204_v15 = vshll.u32 %v203_v13, 23 }
 0x132   :  { %v205_v16 = vor.u32 4788187, %v204_v15  ;;  %v208_v18 = vcvt.s32.f32 %v201_v14 }
 0x134   :  { %v206_v17 = vand.u32 2147483647, %v205_v16 }
 0x136   :  { %v209_v19 = vmul.f32 %v208_v18, %v206_v17 }
 0x138   :  { %v210_v20 = vxor.u32 2147483648, %v209_v19 }
 0x13a   :  { %v211_v21 = vsel %vm128_vm10, %v210_v20, %v209_v19 }
 0x13b   :  { %v214_v23 = vsel %vm127_vm11, %v409_v5, %v211_v21 }
 0x13c   :  { %275 = vcosq.f32 %v214_v23 }
 0x13d   :  { %277 = vsinq.f32 %v214_v23 }
 0x146   :  { %v276_v27 = vpop.eup %275 }
 0x147   :  { %v278_v28 = vpop.eup %277  ;;  %v225_v29 = vxor.u32 2147483648, %v276_v27 }
 0x148   :  { %v222_v30 = vxor.u32 2147483648, %v278_v28 }
 0x149   :  { %v226_v31 = vsel %vm224_vm12, %v225_v29, %v278_v28 }
 0x14a   :  { %v223_v32 = vsel %vm221_vm13, %v276_v27, %v222_v30 }
 0x14b   :  { %v227_v11 = vsel %vm220_vm14, %v223_v32, %v226_v31 }
 0x14c   :  { %v228_v33 = vsel %vm218_vm15, nan, %v227_v11 }
 0x14d   :  { %229 = vst [vmem:[#allocation7] sm:$0xf] %v228_v33 }
 0x14e   :  { %334 = shalt.err (!%p331_p6)
}
 0x14f   :  { %s335_s13 = scalar_lea.hbm %s445_s3, 64 }
 0x150   :  { %p336_p7 = scmp.ne.s32.totalorder %s445_s3, %s335_s13  ;;  %p339_p8 = scmp.lt.u32.totalorder %s335_s13, %s445_s3 }
 0x152   :  { %p341_p9 = pnand %p339_p8, %p336_p7 }
 0x154   :  { %344 = shalt.err (!%p341_p9)
}
 0x155   :  { %239 = dma.vmem_to_hbm [thread:$0]  %s237_s2, 64, %s445_s3, [#allocation4]  }
 0x156   :  { %349 = dma.done.wait [#allocation4], 64  }
 0x157   :  { %350 = vsyncadd [#allocation4], 4294967232 }
 0x158   :  { %243 = vsyncpa [#allocation3], 1 }
 0x159   :  { %244 = vsyncpa [#allocation6], 1 }
 0x15a   :  { %245 = vsyncpa [#allocation4], 1 }

</bundles_post_ra>
